<compile_context>
chip_gen: v7x
topology: tpu7x:2x2x1
jax: 0.10.0
libtpu: 0.0.40
codegen_flags: <defaults>
</compile_context>

<pallas_src>
import functools

import jax
import jax.numpy as jnp
from jax.experimental import pallas as pl
from jax.experimental.pallas import tpu as pltpu


def _round_up(x, m):
    return (x + m - 1) // m * m


# ----------------------------------------------------------------------------
# Pallas kernel: serial recurrence only.
# ----------------------------------------------------------------------------
def _rnn_recurrence_kernel(z_ref, w_hh_ref, out_ref, h_ref, *, block_t, seq_len):
    """h_t = tanh(z_t + h_{t-1} @ W_hh^T)  for block_t consecutive timesteps.

    z_ref   : (block_t, block_b, Hp) bf16  hoisted projection x@W_ih^T + b,
              time-major so z_ref[tau] is one dense (block_b, Hp) tile
    w_hh_ref: (Hp, Hp) bf16                W_hh^T, whole-array resident in VMEM
              (single buffer), fed to the MXU as-is with f32 accumulation
    out_ref : (block_b, Hp)                written once, at the last time block
    h_ref   : (block_b, Hp) f32            VMEM scratch carrying the hidden state
    """
    t_blk = pl.program_id(1)
    n_t = pl.num_programs(1)

    @pl.when(t_blk == 0)
    def _init():
        # PyTorch nn.RNN default initial hidden state is zeros.
        h_ref[...] = jnp.zeros_like(h_ref)

    w_hh = w_hh_ref[...]                      # bf16: MXU-native on all gens

    def run_steps(masked):
        h = h_ref[...]                        # f32 state
        for tau in range(block_t):            # fully unrolled, static slices
            z_t = z_ref[tau].astype(jnp.float32)     # bf16 -> f32 (VPU)
            # Single MXU matmul on the serial chain (bf16 x bf16 -> f32 acc);
            # the precomputed z (x@W_ih^T + b) is added on the VPU.
            pre = z_t + jnp.dot(h.astype(w_hh.dtype), w_hh,
                                preferred_element_type=jnp.float32)
            h_new = jnp.tanh(pre)             # EUP, f32 (v5e-safe)
            if masked:
                # Padded trailing timesteps must not advance the state.
                valid = (t_blk * block_t + tau) < seq_len
                h_new = jnp.where(valid, h_new, h)
            h = h_new
        h_ref[...] = h

    if seq_len % block_t == 0:
        # No T padding anywhere: single unmasked fast path.
        run_steps(False)
    else:
        # Padding exists only in the last time block: keep the VPU
        # compare/select out of the hot path for all other blocks.
        @pl.when(t_blk != n_t - 1)
        def _fast():
            run_steps(False)

        @pl.when(t_blk == n_t - 1)
        def _tail():
            run_steps(True)

    @pl.when(t_blk == n_t - 1)
    def _emit():
        out_ref[...] = h_ref[...].astype(out_ref.dtype)


# ----------------------------------------------------------------------------
# Tiling heuristics.
# ----------------------------------------------------------------------------
def _pick_blocks(B, T, Hp):
    # Batch tile: feed the MXU 128-256 rows per step when B allows, but keep
    # >= 2 batch blocks so the "parallel" axis can shard across v7x's two TCs.
    if B <= 8:
        block_b = 8
    else:
        block_b = min(256, _round_up(-(-B // 2), 8))

    # Time tile: as many steps per grid step as fit a ~24 MiB z double-buffer
    # budget (safe next to the resident weight inside v7x's 64 MiB VMEM),
    # capped at 32 and at the (rounded) sequence length.
    z_unit = 2 * block_b * Hp * 2            # bytes/timestep, bf16, double-buffered
    block_t = int(max(8, min(32, (24 << 20) // max(z_unit, 1))))
    block_t = min(block_t, _round_up(T, 8))
    return block_b, block_t


# ----------------------------------------------------------------------------
# Wrapper.
# ----------------------------------------------------------------------------
def string_rnn_forward(x, w_ih, w_hh, b_ih, b_hh, *, min_pallas_elems=32768):
    """x: (B, T, I) batch-first.  Returns (B, H) == output[:, -1, :]."""
    B, T, I = x.shape
    H = w_ih.shape[0]

    # Small-shape fallback: at the StringRNN defaults (B=2, T=8, H=1) the
    # Pallas path is pure overhead (tile padding + per-grid-step cost); plain
    # XLA scan is faster below this threshold.
    if B * T * H < min_pallas_elems:
        return _string_rnn_scan(x, w_ih, w_hh, b_ih, b_hh)

    Hp = _round_up(H, 128)                   # lane-dense last dim
    block_b, block_t = _pick_blocks(B, T, Hp)
    Bp = _round_up(B, block_b)
    Tp = _round_up(T, block_t)

    # Hoisted input projection: one big parallel matmul in XLA, emitted
    # directly time-major (t, b, h) so no extra transpose pass over HBM is
    # materialized.  Bias folded in before padding, then narrowed to bf16
    # (halves HBM traffic + the z double-buffer; f32 accumulation preserved
    # inside the kernel).
    z = jnp.einsum("bti,hi->tbh", x, w_ih, preferred_element_type=jnp.float32)
    z = (z + (b_ih + b_hh).astype(jnp.float32)).astype(jnp.bfloat16)
    # Zero-pad to dense tiles.  Padded H lanes / batch rows stay exactly 0
    # through the recurrence (zero W_hh rows/cols, tanh(0)=0); padded
    # timesteps are masked in the last time block.  All sliced off below.
    z = jnp.pad(z, ((0, Tp - T), (0, Bp - B), (0, Hp - H)))
    w_hh_t = jnp.pad(jnp.transpose(w_hh),
                     ((0, Hp - H), (0, Hp - H))).astype(jnp.bfloat16)

    n_b = Bp // block_b
    n_t = Tp // block_t

    # Explicit VMEM budget from the actual tiles (z double-buffered bf16,
    # weight single-buffered bf16, output double-buffered, f32 h scratch).
    z_bytes = 2 * block_t * block_b * Hp * 2
    w_bytes = Hp * Hp * 2
    out_bytes = 2 * block_b * Hp * x.dtype.itemsize
    h_bytes = block_b * Hp * 4
    vmem_limit = int(min(100 << 20,
                         max(32 << 20,
                             (z_bytes + w_bytes + out_bytes + h_bytes) * 5 // 4
                             + (2 << 20))))
    # TODO(synk): for Hp >= ~4096 on v7x (64 MiB VMEM) the whole-resident
    # weight no longer fits next to the z buffers; switch to a nested
    # K/N-tiled pltpu.emit_pipeline over W_hh column blocks instead of
    # shrinking block_b.

    kernel = functools.partial(_rnn_recurrence_kernel,
                               block_t=block_t, seq_len=T)

    out = pl.pallas_call(
        kernel,
        out_shape=jax.ShapeDtypeStruct((Bp, Hp), x.dtype),
        grid_spec=pltpu.PrefetchScalarGridSpec(
            num_scalar_prefetch=0,
            grid=(n_b, n_t),
            in_specs=[
                # block_t timesteps of the precomputed projection per grid step
                pl.BlockSpec((block_t, block_b, Hp), lambda b, t: (t, b, 0)),
                # W_hh^T: whole-array, single-buffered, resident in VMEM
                pl.BlockSpec(memory_space=pltpu.MemorySpace.VMEM),
            ],
            out_specs=pl.BlockSpec((block_b, Hp), lambda b, t: (b, 0)),
            scratch_shapes=[pltpu.VMEM((block_b, Hp), jnp.float32)],
        ),
        compiler_params=pltpu.CompilerParams(
            # Batch blocks are independent -> "parallel" (shards across v7x's
            # two TensorCores); the time axis carries the recurrence through
            # the VMEM scratch accumulator.
            dimension_semantics=("parallel", "arbitrary"),
            vmem_limit_bytes=vmem_limit,
        ),
    )(z, w_hh_t)

    return out[:B, :H]


# ----------------------------------------------------------------------------
# Pure-JAX reference / small-shape fallback.
# ----------------------------------------------------------------------------
def _string_rnn_scan(x, w_ih, w_hh, b_ih, b_hh):
    B, T, I = x.shape
    H = w_ih.shape[0]
    h0 = jnp.zeros((B, H), jnp.float32)

    def step(h, x_t):
        h_new = jnp.tanh(x_t @ w_ih.T + b_ih + h @ w_hh.T + b_hh)
        return h_new, None

    h_last, _ = jax.lax.scan(step, h0,
                             jnp.transpose(x, (1, 0, 2)).astype(jnp.float32))
    return h_last.astype(x.dtype)


def string_rnn_reference(x, w_ih, w_hh, b_ih, b_hh):
    return _string_rnn_scan(x, w_ih, w_hh, b_ih, b_hh)


if __name__ == "__main__":
    key = jax.random.PRNGKey(0)

    def make_params(k, I, H):
        k1, k2, k3, k4 = jax.random.split(k, 4)
        bound = 1.0 / (H ** 0.5)      # PyTorch U(-1/sqrt(H), 1/sqrt(H)) init
        return (jax.random.uniform(k1, (H, I), jnp.float32, -bound, bound),
                jax.random.uniform(k2, (H, H), jnp.float32, -bound, bound),
                jax.random.uniform(k3, (H,), jnp.float32, -bound, bound),
                jax.random.uniform(k4, (H,), jnp.float32, -bound, bound))

    # 1) StringRNN defaults: B=2, T=8, input_size=2, hidden_size=1.
    #    Tiny shape -> dispatches to the XLA-scan fallback (exact).
    kx, kp, key = jax.random.split(key, 3)
    x = jax.random.normal(kx, (2, 8, 2), dtype=jnp.float32)
    params = make_params(kp, 2, 1)
    out = jax.block_until_ready(string_rnn_forward(x, *params))
    ref = string_rnn_reference(x, *params)
    assert out.shape == (2, 1)
    assert jnp.allclose(out, ref, atol=1e-5, rtol=1e-5), (out, ref)

    # 2) Same tiny shape forced through the Pallas path (exercises H/B padding
    #    and the single-block grid).  bf16 weights/z -> looser tolerance.
    out_p = jax.block_until_ready(
        string_rnn_forward(x, *params, min_pallas_elems=0))
    assert out_p.shape == (2, 1)
    assert float(jnp.max(jnp.abs(out_p - ref))) < 5e-2, (out_p, ref)

    # 3) Multi-block padded shape: exercises the raised batch tile (2 batch
    #    blocks), the block_t=32 time tiling, the masked last time block
    #    (37 % 32 != 0) and H padding (300 -> 384).
    kx2, kp2, key = jax.random.split(key, 3)
    x2 = jax.random.normal(kx2, (200, 37, 16), dtype=jnp.float32)
    params2 = make_params(kp2, 16, 300)
    out2 = jax.block_until_ready(string_rnn_forward(x2, *params2))
    ref2 = string_rnn_reference(x2, *params2)
    assert out2.shape == (200, 300)
    assert float(jnp.max(jnp.abs(out2 - ref2))) < 5e-2

    print("KERNEL_OK")
</pallas_src>

<mosaic_0001>
module attributes {stable_mosaic.version = 11 : i64} {
  func.func @_rnn_recurrence_kernel(%arg0: i32, %arg1: i32, %arg2: memref<8x8x128xbf16, #tpu.memory_space<vmem>>, %arg3: memref<128x128xbf16, #tpu.memory_space<vmem>>, %arg4: memref<8x128xf32, #tpu.memory_space<vmem>>, %arg5: memref<8x128xf32, #tpu.memory_space<vmem>>) attributes {dimension_semantics = [#tpu.dimension_semantics<parallel>, #tpu.dimension_semantics<arbitrary>], iteration_bounds = array<i64: 1, 1>, scalar_prefetch = 0 : i64, scratch_operands = 1 : i64, tpu.core_type = #tpu.core_type<tc>, window_params = [{transform_indices = @transform_0, window_bounds = array<i64: 8, 8, 128>}, {pipeline_mode = #tpu.pipeline_mode<synchronous>, transform_indices = @transform_1, window_bounds = array<i64: 128, 128>}, {transform_indices = @transform_2, window_bounds = array<i64: 8, 128>}]} {
    %c0_i32 = arith.constant 0 : i32
    %0 = arith.cmpi eq, %arg1, %c0_i32 : i32
    %1 = arith.extui %0 : i1 to i32
    %c0_i32_0 = arith.constant 0 : i32
    %2 = arith.cmpi ne, %1, %c0_i32_0 : i32
    scf.if %2 {
      %cst_32 = arith.constant 0.000000e+00 : f32
      %65 = vector.broadcast %cst_32 : f32 to vector<8x128xf32>
      %c0_33 = arith.constant 0 : index
      %c0_34 = arith.constant 0 : index
      %66 = vector.load %arg5[%c0_33, %c0_34] : memref<8x128xf32, #tpu.memory_space<vmem>>, vector<8x128xf32>
      tpu.vector_store %arg5[%c0_33, %c0_34], %65 {strides = array<i32>} : memref<8x128xf32, #tpu.memory_space<vmem>>, vector<8x128xf32>,
    } else {
    }
    %c0 = arith.constant 0 : index
    %c0_1 = arith.constant 0 : index
    %3 = vector.load %arg3[%c0, %c0_1] : memref<128x128xbf16, #tpu.memory_space<vmem>>, vector<128x128xbf16>
    %c0_2 = arith.constant 0 : index
    %c0_3 = arith.constant 0 : index
    %4 = vector.load %arg5[%c0_2, %c0_3] : memref<8x128xf32, #tpu.memory_space<vmem>>, vector<8x128xf32>
    %c0_4 = arith.constant 0 : index
    %c0_5 = arith.constant 0 : index
    %c0_6 = arith.constant 0 : index
    %5 = vector.load %arg2[%c0_4, %c0_5, %c0_6] : memref<8x8x128xbf16, #tpu.memory_space<vmem>>, vector<1x8x128xbf16>
    %6 = vector.shape_cast %5 : vector<1x8x128xbf16> to vector<8x128xbf16>
    %7 = arith.extf %6 : vector<8x128xbf16> to vector<8x128xf32>
    %8 = arith.truncf %4 : vector<8x128xf32> to vector<8x128xbf16>
    %cst = arith.constant dense<0.000000e+00> : vector<8x128xf32>
    %9 = tpu.matmul %8, %3, %cst {dimension_numbers = #tpu.dot_dimension_numbers<[1], [0], [0], [1], [0, 0, 1, 1], [], []>} : vector<8x128xbf16>, vector<128x128xbf16>, vector<8x128xf32> -> vector<8x128xf32>
    %10 = arith.addf %7, %9 : vector<8x128xf32>
    %11 = math.tanh %10 : vector<8x128xf32>
    %c1 = arith.constant 1 : index
    %c0_7 = arith.constant 0 : index
    %c0_8 = arith.constant 0 : index
    %12 = vector.load %arg2[%c1, %c0_7, %c0_8] : memref<8x8x128xbf16, #tpu.memory_space<vmem>>, vector<1x8x128xbf16>
    %13 = vector.shape_cast %12 : vector<1x8x128xbf16> to vector<8x128xbf16>
    %14 = arith.extf %13 : vector<8x128xbf16> to vector<8x128xf32>
    %15 = arith.truncf %11 : vector<8x128xf32> to vector<8x128xbf16>
    %cst_9 = arith.constant dense<0.000000e+00> : vector<8x128xf32>
    %16 = tpu.matmul %15, %3, %cst_9 {dimension_numbers = #tpu.dot_dimension_numbers<[1], [0], [0], [1], [0, 0, 1, 1], [], []>} : vector<8x128xbf16>, vector<128x128xbf16>, vector<8x128xf32> -> vector<8x128xf32>
    %17 = arith.addf %14, %16 : vector<8x128xf32>
    %18 = math.tanh %17 : vector<8x128xf32>
    %c2 = arith.constant 2 : index
    %c0_10 = arith.constant 0 : index
    %c0_11 = arith.constant 0 : index
    %19 = vector.load %arg2[%c2, %c0_10, %c0_11] : memref<8x8x128xbf16, #tpu.memory_space<vmem>>, vector<1x8x128xbf16>
    %20 = vector.shape_cast %19 : vector<1x8x128xbf16> to vector<8x128xbf16>
    %21 = arith.extf %20 : vector<8x128xbf16> to vector<8x128xf32>
    %22 = arith.truncf %18 : vector<8x128xf32> to vector<8x128xbf16>
    %cst_12 = arith.constant dense<0.000000e+00> : vector<8x128xf32>
    %23 = tpu.matmul %22, %3, %cst_12 {dimension_numbers = #tpu.dot_dimension_numbers<[1], [0], [0], [1], [0, 0, 1, 1], [], []>} : vector<8x128xbf16>, vector<128x128xbf16>, vector<8x128xf32> -> vector<8x128xf32>
    %24 = arith.addf %21, %23 : vector<8x128xf32>
    %25 = math.tanh %24 : vector<8x128xf32>
    %c3 = arith.constant 3 : index
    %c0_13 = arith.constant 0 : index
    %c0_14 = arith.constant 0 : index
    %26 = vector.load %arg2[%c3, %c0_13, %c0_14] : memref<8x8x128xbf16, #tpu.memory_space<vmem>>, vector<1x8x128xbf16>
    %27 = vector.shape_cast %26 : vector<1x8x128xbf16> to vector<8x128xbf16>
    %28 = arith.extf %27 : vector<8x128xbf16> to vector<8x128xf32>
    %29 = arith.truncf %25 : vector<8x128xf32> to vector<8x128xbf16>
    %cst_15 = arith.constant dense<0.000000e+00> : vector<8x128xf32>
    %30 = tpu.matmul %29, %3, %cst_15 {dimension_numbers = #tpu.dot_dimension_numbers<[1], [0], [0], [1], [0, 0, 1, 1], [], []>} : vector<8x128xbf16>, vector<128x128xbf16>, vector<8x128xf32> -> vector<8x128xf32>
    %31 = arith.addf %28, %30 : vector<8x128xf32>
    %32 = math.tanh %31 : vector<8x128xf32>
    %c4 = arith.constant 4 : index
    %c0_16 = arith.constant 0 : index
    %c0_17 = arith.constant 0 : index
    %33 = vector.load %arg2[%c4, %c0_16, %c0_17] : memref<8x8x128xbf16, #tpu.memory_space<vmem>>, vector<1x8x128xbf16>
    %34 = vector.shape_cast %33 : vector<1x8x128xbf16> to vector<8x128xbf16>
    %35 = arith.extf %34 : vector<8x128xbf16> to vector<8x128xf32>
    %36 = arith.truncf %32 : vector<8x128xf32> to vector<8x128xbf16>
    %cst_18 = arith.constant dense<0.000000e+00> : vector<8x128xf32>
    %37 = tpu.matmul %36, %3, %cst_18 {dimension_numbers = #tpu.dot_dimension_numbers<[1], [0], [0], [1], [0, 0, 1, 1], [], []>} : vector<8x128xbf16>, vector<128x128xbf16>, vector<8x128xf32> -> vector<8x128xf32>
    %38 = arith.addf %35, %37 : vector<8x128xf32>
    %39 = math.tanh %38 : vector<8x128xf32>
    %c5 = arith.constant 5 : index
    %c0_19 = arith.constant 0 : index
    %c0_20 = arith.constant 0 : index
    %40 = vector.load %arg2[%c5, %c0_19, %c0_20] : memref<8x8x128xbf16, #tpu.memory_space<vmem>>, vector<1x8x128xbf16>
    %41 = vector.shape_cast %40 : vector<1x8x128xbf16> to vector<8x128xbf16>
    %42 = arith.extf %41 : vector<8x128xbf16> to vector<8x128xf32>
    %43 = arith.truncf %39 : vector<8x128xf32> to vector<8x128xbf16>
    %cst_21 = arith.constant dense<0.000000e+00> : vector<8x128xf32>
    %44 = tpu.matmul %43, %3, %cst_21 {dimension_numbers = #tpu.dot_dimension_numbers<[1], [0], [0], [1], [0, 0, 1, 1], [], []>} : vector<8x128xbf16>, vector<128x128xbf16>, vector<8x128xf32> -> vector<8x128xf32>
    %45 = arith.addf %42, %44 : vector<8x128xf32>
    %46 = math.tanh %45 : vector<8x128xf32>
    %c6 = arith.constant 6 : index
    %c0_22 = arith.constant 0 : index
    %c0_23 = arith.constant 0 : index
    %47 = vector.load %arg2[%c6, %c0_22, %c0_23] : memref<8x8x128xbf16, #tpu.memory_space<vmem>>, vector<1x8x128xbf16>
    %48 = vector.shape_cast %47 : vector<1x8x128xbf16> to vector<8x128xbf16>
    %49 = arith.extf %48 : vector<8x128xbf16> to vector<8x128xf32>
    %50 = arith.truncf %46 : vector<8x128xf32> to vector<8x128xbf16>
    %cst_24 = arith.constant dense<0.000000e+00> : vector<8x128xf32>
    %51 = tpu.matmul %50, %3, %cst_24 {dimension_numbers = #tpu.dot_dimension_numbers<[1], [0], [0], [1], [0, 0, 1, 1], [], []>} : vector<8x128xbf16>, vector<128x128xbf16>, vector<8x128xf32> -> vector<8x128xf32>
    %52 = arith.addf %49, %51 : vector<8x128xf32>
    %53 = math.tanh %52 : vector<8x128xf32>
    %c7 = arith.constant 7 : index
    %c0_25 = arith.constant 0 : index
    %c0_26 = arith.constant 0 : index
    %54 = vector.load %arg2[%c7, %c0_25, %c0_26] : memref<8x8x128xbf16, #tpu.memory_space<vmem>>, vector<1x8x128xbf16>
    %55 = vector.shape_cast %54 : vector<1x8x128xbf16> to vector<8x128xbf16>
    %56 = arith.extf %55 : vector<8x128xbf16> to vector<8x128xf32>
    %57 = arith.truncf %53 : vector<8x128xf32> to vector<8x128xbf16>
    %cst_27 = arith.constant dense<0.000000e+00> : vector<8x128xf32>
    %58 = tpu.matmul %57, %3, %cst_27 {dimension_numbers = #tpu.dot_dimension_numbers<[1], [0], [0], [1], [0, 0, 1, 1], [], []>} : vector<8x128xbf16>, vector<128x128xbf16>, vector<8x128xf32> -> vector<8x128xf32>
    %59 = arith.addf %56, %58 : vector<8x128xf32>
    %60 = math.tanh %59 : vector<8x128xf32>
    %c0_28 = arith.constant 0 : index
    %c0_29 = arith.constant 0 : index
    %61 = vector.load %arg5[%c0_28, %c0_29] : memref<8x128xf32, #tpu.memory_space<vmem>>, vector<8x128xf32>
    tpu.vector_store %arg5[%c0_28, %c0_29], %60 {strides = array<i32>} : memref<8x128xf32, #tpu.memory_space<vmem>>, vector<8x128xf32>,
    %c0_i32_30 = arith.constant 0 : i32
    %62 = arith.cmpi eq, %arg1, %c0_i32_30 : i32
    %63 = arith.extui %62 : i1 to i32
    %c0_i32_31 = arith.constant 0 : i32
    %64 = arith.cmpi ne, %63, %c0_i32_31 : i32
    scf.if %64 {
      %c0_32 = arith.constant 0 : index
      %c0_33 = arith.constant 0 : index
      %65 = vector.load %arg5[%c0_32, %c0_33] : memref<8x128xf32, #tpu.memory_space<vmem>>, vector<8x128xf32>
      %c0_34 = arith.constant 0 : index
      %c0_35 = arith.constant 0 : index
      %66 = vector.load %arg4[%c0_34, %c0_35] : memref<8x128xf32, #tpu.memory_space<vmem>>, vector<8x128xf32>
      tpu.vector_store %arg4[%c0_34, %c0_35], %65 {strides = array<i32>} : memref<8x128xf32, #tpu.memory_space<vmem>>, vector<8x128xf32>,
    } else {
    }
    return
  }
  func.func @transform_0(%arg0: i32, %arg1: i32) -> (i32, i32, i32) {
    %c0_i32 = arith.constant 0 : i32
    %c0_i32_0 = arith.constant 0 : i32
    return %arg1, %arg0, %c0_i32 : i32, i32, i32
  }
  func.func @transform_1(%arg0: i32, %arg1: i32) -> (i32, i32) {
    %c0_i32 = arith.constant 0 : i32
    %c0_i32_0 = arith.constant 0 : i32
    %c0_i32_1 = arith.constant 0 : i32
    return %c0_i32, %c0_i32_0 : i32, i32
  }
  func.func @transform_2(%arg0: i32, %arg1: i32) -> (i32, i32) {
    %c0_i32 = arith.constant 0 : i32
    %c0_i32_0 = arith.constant 0 : i32
    return %arg0, %c0_i32 : i32, i32
  }
}

</mosaic_0001>

<bundles_post_ra>
// kernel: tpu_custom_call.1
= control target key start
LH: loop header
LB: loop body
LE: loop exit
PB: predicated region body
PF: predicated region fallthrough
CT: control target
= control target key end

     0   :  { %7 = vsyncpa [#allocation4], 0  ;;  %s1063_s0 = inlined_call_operand.hbm [shape: bf16[8,8,128], index: 0, kind: input, shape index: {}]   ;;  %s1064_s1 = inlined_call_operand.hbm [shape: bf16[128,128], index: 1, kind: input, shape index: {}]   ;;  %s1065_s2 = inlined_call_operand.hbm [shape: f32[8,128], index: 2, kind: output, shape index: {}]  }
   0x1   :  { %8 = vsyncpa [#allocation7], 0 }
   0x2   :  { %9 = vsyncpa [#allocation5], 0  ;;  %s844_s9 = smov [#allocation3]   ;;  %s772_s13 = scalar_lea.hbm %s1063_s0, 512 }
   0x3   :  { %s15_s10 = sshll.u32 %s844_s9, 4  ;;  %p773_p0 = scmp.ne.s32.totalorder %s1063_s0, %s772_s13  ;;  %s16_s10 = int_to_ptr.vmem [resolvable:$true] %s15_s10 }
   0x4   :  { %p776_p1 = scmp.lt.u32.totalorder %s772_s13, %s1063_s0 }
   0x6   :  { %p778_p2 = pnand %p776_p1, %p773_p0 }
   0x8   :  { %781 = shalt.err (!%p778_p2)
}
   0x9   :  { %s782_s18 = scalar_lea.vmem %s16_s10, 512  ;;  %p787_p4 = scmp.lt.s32.totalorder %s16_s10, %s16_s10 }
   0xa   :  { %p783_p3 = scmp.ne.s32.totalorder %s16_s10, %s782_s18  ;;  %p788_p5 = scmp.lt.s32.totalorder %s782_s18, %s782_s18 }
   0xc   :  { %p789_p6 = por %p788_p5, %p787_p4 }
   0xe   :  { %p790_p7 = pnand %p789_p6, %p783_p3 }
  0x10   :  { %793 = shalt.err (!%p790_p7)
}
  0x11   :  { %s845_s19 = smov 64   ;;  %s846_s20 = smov 4  }
  0x12   :  { %21 = dma.hbm_to_vmem [thread:$0]  %s1063_s0, 512, %s16_s10, [#allocation4], %s845_s19, %s845_s19, %s846_s20  }
  0x13   :  { %s847_s23 = smov [#allocation6]   ;;  %s794_s27 = scalar_lea.hbm %s1064_s1, 1024 }
  0x14   :  { %s27_s24 = sshll.u32 %s847_s23, 4  ;;  %p795_p8 = scmp.ne.s32.totalorder %s1064_s1, %s794_s27  ;;  %s28_s24 = int_to_ptr.vmem [resolvable:$true] %s27_s24 }
  0x15   :  { %p798_p9 = scmp.lt.u32.totalorder %s794_s27, %s1064_s1 }
  0x17   :  { %p800_p10 = pnand %p798_p9, %p795_p8 }
  0x19   :  { %803 = shalt.err (!%p800_p10)
}
  0x1a   :  { %s804_s4 = scalar_lea.vmem %s28_s24, 1024  ;;  %p809_p12 = scmp.lt.s32.totalorder %s28_s24, %s28_s24 }
  0x1b   :  { %p805_p11 = scmp.ne.s32.totalorder %s28_s24, %s804_s4  ;;  %p810_p13 = scmp.lt.s32.totalorder %s804_s4, %s804_s4 }
  0x1d   :  { %p811_p0 = por %p810_p13, %p809_p12 }
  0x1f   :  { %p812_p1 = pnand %p811_p0, %p805_p11 }
  0x21   :  { %815 = shalt.err (!%p812_p1)
}
  0x22   :  { %33 = dma.hbm_to_vmem [thread:$0]  %s1064_s1, 1024, %s28_s24, [#allocation7], %s845_s19, %s845_s19, %s846_s20  }
  0x23   :  { %838 = dma.done.wait [#allocation4], 512  }
  0x24   :  { %839 = vsyncadd [#allocation4], 4294966784 }
  0x25   :  { %840 = dma.done.wait [#allocation7], 1024  }
  0x26   :  { %841 = vsyncadd [#allocation7], 4294966272  ;;  %v848_v0 = vmov 0.0   ;;  %vm849_vm0 = vmmov 0   ;;  %v897_v1 = vld [vmem:[#allocation6] sm:$0xff]   ;;  %v900_v2 = vld [vmem:[#allocation6 + $0x8] sm:$0xff]  }
  0x27   :  { %580 = vmatprep.subr.bf16.mxu0 %v848_v0  ;;  %596 = vmatprep.mubr.msk.bf16.mxu0 %vm849_vm0, %v848_v0  ;;  %v906_v3 = vld [vmem:[#allocation6 + $0x10] sm:$0xff]   ;;  %v912_v4 = vld [vmem:[#allocation6 + $0x18] sm:$0xff]   ;;  %v918_v5 = vld [vmem:[#allocation6 + $0x20] sm:$0xff]   ;;  %v850_v9 = vmov 0.0|0.0   ;;  %s851_s1 = smov [#allocation8]  }
  0x28   :  { %600 = vmatprep.subr.bf16.mxu1 %v848_v0  ;;  %616 = vmatprep.mubr.msk.bf16.mxu1 %vm849_vm0, %v848_v0  ;;  %v924_v6 = vld [vmem:[#allocation6 + $0x28] sm:$0xff]   ;;  %v930_v7 = vld [vmem:[#allocation6 + $0x30] sm:$0xff]   ;;  %v936_v8 = vld [vmem:[#allocation6 + $0x38] sm:$0xff]   ;;  %s490_s6 = sshll.u32 %s851_s1, 4  ;;  %s491_s6 = int_to_ptr.vmem [resolvable:$true] %s490_s6 }
  0x29   :  { %581 = vmatpush3.bf16.msra.mxu0 %v897_v1  ;;  %601 = vmatpush3.bf16.msra.mxu1 %v897_v1  ;;  %v63_v10 = vld [vmem:[#allocation3] sm:$0xff]   ;;  %v203_v27 = vld [vmem:[#allocation3 + $0x8] sm:$0xff]   ;;  %v295_v44 = vld [vmem:[#allocation3 + $0x10] sm:$0xff]   ;;  %s816_s7 = scalar_lea.vmem %s491_s6, 128  ;;  %p821_p3 = scmp.lt.s32.totalorder %s491_s6, %s491_s6 }
  0x2a   :  { %582 = vmatprep.subr.bf16.mxu0 %v848_v0  ;;  %602 = vmatprep.subr.bf16.mxu1 %v848_v0  ;;  %v64_v11 = vunpack.c.l.bf16 %v63_v10  ;;  %v158_v19 = vunpack.c.h.bf16 %v63_v10  ;;  %v204_v28 = vunpack.c.l.bf16 %v203_v27  ;;  %v250_v36 = vunpack.c.h.bf16 %v203_v27  ;;  %v387_v61 = vld [vmem:[#allocation3 + $0x18] sm:$0xff]   ;;  %p817_p2 = scmp.ne.s32.totalorder %s491_s6, %s816_s7  ;;  %p822_p4 = scmp.lt.s32.totalorder %s816_s7, %s816_s7 }
  0x2b   :  { %v296_v45 = vunpack.c.l.bf16 %v295_v44  ;;  %v342_v53 = vunpack.c.h.bf16 %v295_v44  ;;  %v388_v62 = vunpack.c.l.bf16 %v387_v61 }
  0x2c   :  { %p823_p5 = por %p822_p4, %p821_p3 }
  0x2d   :  { %583 = vmatpush3.bf16.msra.mxu0 %v900_v2  ;;  %603 = vmatpush3.bf16.msra.mxu1 %v900_v2 }
  0x2e   :  { %584 = vmatprep.subr.bf16.mxu0 %v848_v0  ;;  %604 = vmatprep.subr.bf16.mxu1 %v848_v0  ;;  %p824_p6 = pnand %p823_p5, %p817_p2 }
  0x31   :  { %585 = vmatpush3.bf16.msra.mxu0 %v906_v3  ;;  %605 = vmatpush3.bf16.msra.mxu1 %v906_v3 }
  0x32   :  { %586 = vmatprep.subr.bf16.mxu0 %v848_v0  ;;  %606 = vmatprep.subr.bf16.mxu1 %v848_v0 }
  0x35   :  { %587 = vmatpush3.bf16.msra.mxu0 %v912_v4  ;;  %607 = vmatpush3.bf16.msra.mxu1 %v912_v4 }
  0x36   :  { %588 = vmatprep.subr.bf16.mxu0 %v848_v0  ;;  %608 = vmatprep.subr.bf16.mxu1 %v848_v0 }
  0x39   :  { %589 = vmatpush3.bf16.msra.mxu0 %v918_v5  ;;  %609 = vmatpush3.bf16.msra.mxu1 %v918_v5 }
  0x3a   :  { %590 = vmatprep.subr.bf16.mxu0 %v848_v0  ;;  %610 = vmatprep.subr.bf16.mxu1 %v848_v0 }
  0x3d   :  { %591 = vmatpush3.bf16.msra.mxu0 %v924_v6  ;;  %611 = vmatpush3.bf16.msra.mxu1 %v924_v6 }
  0x3e   :  { %592 = vmatprep.subr.bf16.mxu0 %v848_v0  ;;  %612 = vmatprep.subr.bf16.mxu1 %v848_v0 }
  0x41   :  { %593 = vmatpush3.bf16.msra.mxu0 %v930_v7  ;;  %613 = vmatpush3.bf16.msra.mxu1 %v930_v7 }
  0x42   :  { %594 = vmatprep.subr.bf16.mxu0 %v848_v0  ;;  %614 = vmatprep.subr.bf16.mxu1 %v848_v0 }
  0x45   :  { %595 = vmatpush3.bf16.msra.mxu0 %v936_v8  ;;  %615 = vmatpush3.bf16.msra.mxu1 %v936_v8 }
  0x46   :  { %620 = vmatprep.subr.bf16.mxu0 %v848_v0  ;;  %640 = vmatprep.subr.bf16.mxu1 %v848_v0 }
  0x48   :  { %597 = vmatmul.mubr.bf16.vlgmr.msra.gmra.mrb[0].mxu0 %v850_v9 }
  0x49   :  { %621 = vmatpush3.bf16.msra.mxu0 %v897_v1  ;;  %636 = vmatprep.mubr.msk.bf16.mxu0 %vm849_vm0, %v848_v0 }
  0x4a   :  { %622 = vmatprep.subr.bf16.mxu0 %v848_v0 }
  0x4d   :  { %623 = vmatpush3.bf16.msra.mxu0 %v900_v2 }
  0x4e   :  { %624 = vmatprep.subr.bf16.mxu0 %v848_v0 }
  0x51   :  { %625 = vmatpush3.bf16.msra.mxu0 %v906_v3 }
  0x52   :  { %626 = vmatprep.subr.bf16.mxu0 %v848_v0 }
  0x55   :  { %627 = vmatpush3.bf16.msra.mxu0 %v912_v4 }
  0x56   :  { %628 = vmatprep.subr.bf16.mxu0 %v848_v0 }
  0x59   :  { %629 = vmatpush3.bf16.msra.mxu0 %v918_v5 }
  0x5a   :  { %630 = vmatprep.subr.bf16.mxu0 %v848_v0 }
  0x5d   :  { %631 = vmatpush3.bf16.msra.mxu0 %v924_v6 }
  0x5e   :  { %632 = vmatprep.subr.bf16.mxu0 %v848_v0 }
  0x61   :  { %633 = vmatpush3.bf16.msra.mxu0 %v930_v7 }
  0x62   :  { %634 = vmatprep.subr.bf16.mxu0 %v848_v0 }
  0x65   :  { %635 = vmatpush3.bf16.msra.mxu0 %v936_v8 }
  0x66   :  { %660 = vmatprep.subr.bf16.mxu0 %v848_v0 }
 0x11b   :  { %v148_v12 = vpop.f32.mrb[0].mxu0 }
 0x11c   :  { %v154_v13 = vadd.f32 %v148_v12, %v64_v11  ;;  %v598_v14 = vpop.f32.mrb[1].mxu0 }
 0x11d   :  { %v151_v15 = vpop.f32.mrb[2].mxu0 }
 0x11e   :  { %756 = vtanh.f32 %v154_v13  ;;  %v599_v16 = vpop.f32.mrb[3].mxu0 }
 0x128   :  { %v757_v17 = vpop.eup %756 }
 0x129   :  { %v159_v18 = vpack.c.bf16 %v757_v17, %v757_v17 }
 0x12b   :  { %617 = vmatmul.mubr.bf16.vlgmr.msra.gmra.mrb[0].mxu1 %v159_v18 }
 0x12c   :  { %641 = vmatpush3.bf16.msra.mxu1 %v897_v1  ;;  %656 = vmatprep.mubr.msk.bf16.mxu1 %vm849_vm0, %v848_v0 }
 0x12d   :  { %642 = vmatprep.subr.bf16.mxu1 %v848_v0 }
 0x130   :  { %643 = vmatpush3.bf16.msra.mxu1 %v900_v2 }
 0x131   :  { %644 = vmatprep.subr.bf16.mxu1 %v848_v0 }
 0x134   :  { %645 = vmatpush3.bf16.msra.mxu1 %v906_v3 }
 0x135   :  { %646 = vmatprep.subr.bf16.mxu1 %v848_v0 }
 0x138   :  { %647 = vmatpush3.bf16.msra.mxu1 %v912_v4 }
 0x139   :  { %648 = vmatprep.subr.bf16.mxu1 %v848_v0 }
 0x13c   :  { %649 = vmatpush3.bf16.msra.mxu1 %v918_v5 }
 0x13d   :  { %650 = vmatprep.subr.bf16.mxu1 %v848_v0 }
 0x140   :  { %651 = vmatpush3.bf16.msra.mxu1 %v924_v6 }
 0x141   :  { %652 = vmatprep.subr.bf16.mxu1 %v848_v0 }
 0x144   :  { %653 = vmatpush3.bf16.msra.mxu1 %v930_v7 }
 0x145   :  { %654 = vmatprep.subr.bf16.mxu1 %v848_v0 }
 0x148   :  { %655 = vmatpush3.bf16.msra.mxu1 %v936_v8 }
 0x149   :  { %680 = vmatprep.subr.bf16.mxu1 %v848_v0 }
 0x1fe   :  { %v194_v20 = vpop.f32.mrb[0].mxu1 }
 0x1ff   :  { %v200_v21 = vadd.f32 %v194_v20, %v158_v19  ;;  %v618_v22 = vpop.f32.mrb[1].mxu1 }
 0x200   :  { %v197_v23 = vpop.f32.mrb[2].mxu1 }
 0x201   :  { %758 = vtanh.f32 %v200_v21  ;;  %v619_v24 = vpop.f32.mrb[3].mxu1 }
 0x20b   :  { %v759_v25 = vpop.eup %758 }
 0x20c   :  { %v205_v26 = vpack.c.bf16 %v759_v25, %v759_v25 }
 0x20e   :  { %637 = vmatmul.mubr.bf16.vlgmr.msra.gmra.mrb[4].mxu0 %v205_v26 }
 0x20f   :  { %661 = vmatpush3.bf16.msra.mxu0 %v897_v1  ;;  %676 = vmatprep.mubr.msk.bf16.mxu0 %vm849_vm0, %v848_v0 }
 0x210   :  { %662 = vmatprep.subr.bf16.mxu0 %v848_v0 }
 0x213   :  { %663 = vmatpush3.bf16.msra.mxu0 %v900_v2 }
 0x214   :  { %664 = vmatprep.subr.bf16.mxu0 %v848_v0 }
 0x217   :  { %665 = vmatpush3.bf16.msra.mxu0 %v906_v3 }
 0x218   :  { %666 = vmatprep.subr.bf16.mxu0 %v848_v0 }
 0x21b   :  { %667 = vmatpush3.bf16.msra.mxu0 %v912_v4 }
 0x21c   :  { %668 = vmatprep.subr.bf16.mxu0 %v848_v0 }
 0x21f   :  { %669 = vmatpush3.bf16.msra.mxu0 %v918_v5 }
 0x220   :  { %670 = vmatprep.subr.bf16.mxu0 %v848_v0 }
 0x223   :  { %671 = vmatpush3.bf16.msra.mxu0 %v924_v6 }
 0x224   :  { %672 = vmatprep.subr.bf16.mxu0 %v848_v0 }
 0x227   :  { %673 = vmatpush3.bf16.msra.mxu0 %v930_v7 }
 0x228   :  { %674 = vmatprep.subr.bf16.mxu0 %v848_v0 }
 0x22b   :  { %675 = vmatpush3.bf16.msra.mxu0 %v936_v8 }
 0x22c   :  { %700 = vmatprep.subr.bf16.mxu0 %v848_v0 }
 0x2e1   :  { %v240_v29 = vpop.f32.mrb[4].mxu0 }
 0x2e2   :  { %v246_v30 = vadd.f32 %v240_v29, %v204_v28  ;;  %v638_v31 = vpop.f32.mrb[5].mxu0 }
 0x2e3   :  { %v243_v32 = vpop.f32.mrb[6].mxu0 }
 0x2e4   :  { %760 = vtanh.f32 %v246_v30  ;;  %v639_v33 = vpop.f32.mrb[7].mxu0 }
 0x2ee   :  { %v761_v34 = vpop.eup %760 }
 0x2ef   :  { %v251_v35 = vpack.c.bf16 %v761_v34, %v761_v34 }
 0x2f1   :  { %657 = vmatmul.mubr.bf16.vlgmr.msra.gmra.mrb[4].mxu1 %v251_v35 }
 0x2f2   :  { %681 = vmatpush3.bf16.msra.mxu1 %v897_v1  ;;  %696 = vmatprep.mubr.msk.bf16.mxu1 %vm849_vm0, %v848_v0 }
 0x2f3   :  { %682 = vmatprep.subr.bf16.mxu1 %v848_v0 }
 0x2f6   :  { %683 = vmatpush3.bf16.msra.mxu1 %v900_v2 }
 0x2f7   :  { %684 = vmatprep.subr.bf16.mxu1 %v848_v0 }
 0x2fa   :  { %685 = vmatpush3.bf16.msra.mxu1 %v906_v3 }
 0x2fb   :  { %686 = vmatprep.subr.bf16.mxu1 %v848_v0 }
 0x2fe   :  { %687 = vmatpush3.bf16.msra.mxu1 %v912_v4 }
 0x2ff   :  { %688 = vmatprep.subr.bf16.mxu1 %v848_v0 }
 0x302   :  { %689 = vmatpush3.bf16.msra.mxu1 %v918_v5 }
 0x303   :  { %690 = vmatprep.subr.bf16.mxu1 %v848_v0 }
 0x306   :  { %691 = vmatpush3.bf16.msra.mxu1 %v924_v6 }
 0x307   :  { %692 = vmatprep.subr.bf16.mxu1 %v848_v0 }
 0x30a   :  { %693 = vmatpush3.bf16.msra.mxu1 %v930_v7 }
 0x30b   :  { %694 = vmatprep.subr.bf16.mxu1 %v848_v0 }
 0x30e   :  { %695 = vmatpush3.bf16.msra.mxu1 %v936_v8 }
 0x30f   :  { %720 = vmatprep.subr.bf16.mxu1 %v848_v0 }
 0x3c4   :  { %v286_v37 = vpop.f32.mrb[4].mxu1 }
 0x3c5   :  { %v292_v38 = vadd.f32 %v286_v37, %v250_v36  ;;  %v658_v39 = vpop.f32.mrb[5].mxu1 }
 0x3c6   :  { %v289_v40 = vpop.f32.mrb[6].mxu1 }
 0x3c7   :  { %762 = vtanh.f32 %v292_v38  ;;  %v659_v41 = vpop.f32.mrb[7].mxu1 }
 0x3d1   :  { %v763_v42 = vpop.eup %762 }
 0x3d2   :  { %v297_v43 = vpack.c.bf16 %v763_v42, %v763_v42 }
 0x3d4   :  { %677 = vmatmul.mubr.bf16.vlgmr.msra.gmra.mrb[8].mxu0 %v297_v43 }
 0x3d5   :  { %701 = vmatpush3.bf16.msra.mxu0 %v897_v1  ;;  %716 = vmatprep.mubr.msk.bf16.mxu0 %vm849_vm0, %v848_v0 }
 0x3d6   :  { %702 = vmatprep.subr.bf16.mxu0 %v848_v0 }
 0x3d9   :  { %703 = vmatpush3.bf16.msra.mxu0 %v900_v2 }
 0x3da   :  { %704 = vmatprep.subr.bf16.mxu0 %v848_v0 }
 0x3dd   :  { %705 = vmatpush3.bf16.msra.mxu0 %v906_v3 }
 0x3de   :  { %706 = vmatprep.subr.bf16.mxu0 %v848_v0 }
 0x3e1   :  { %707 = vmatpush3.bf16.msra.mxu0 %v912_v4 }
 0x3e2   :  { %708 = vmatprep.subr.bf16.mxu0 %v848_v0 }
 0x3e5   :  { %709 = vmatpush3.bf16.msra.mxu0 %v918_v5 }
 0x3e6   :  { %710 = vmatprep.subr.bf16.mxu0 %v848_v0 }
 0x3e9   :  { %711 = vmatpush3.bf16.msra.mxu0 %v924_v6 }
 0x3ea   :  { %712 = vmatprep.subr.bf16.mxu0 %v848_v0 }
 0x3ed   :  { %713 = vmatpush3.bf16.msra.mxu0 %v930_v7 }
 0x3ee   :  { %714 = vmatprep.subr.bf16.mxu0 %v848_v0 }
 0x3f1   :  { %715 = vmatpush3.bf16.msra.mxu0 %v936_v8 }
 0x4a7   :  { %v332_v46 = vpop.f32.mrb[8].mxu0 }
 0x4a8   :  { %v338_v47 = vadd.f32 %v332_v46, %v296_v45  ;;  %v678_v48 = vpop.f32.mrb[9].mxu0 }
 0x4a9   :  { %v335_v49 = vpop.f32.mrb[10].mxu0 }
 0x4aa   :  { %764 = vtanh.f32 %v338_v47  ;;  %v679_v50 = vpop.f32.mrb[11].mxu0 }
 0x4b4   :  { %v765_v51 = vpop.eup %764 }
 0x4b5   :  { %v343_v52 = vpack.c.bf16 %v765_v51, %v765_v51 }
 0x4b7   :  { %697 = vmatmul.mubr.bf16.vlgmr.msra.gmra.mrb[8].mxu1 %v343_v52 }
 0x4b8   :  { %721 = vmatpush3.bf16.msra.mxu1 %v897_v1  ;;  %736 = vmatprep.mubr.msk.bf16.mxu1 %vm849_vm0, %v848_v0 }
 0x4b9   :  { %722 = vmatprep.subr.bf16.mxu1 %v848_v0 }
 0x4bc   :  { %723 = vmatpush3.bf16.msra.mxu1 %v900_v2 }
 0x4bd   :  { %724 = vmatprep.subr.bf16.mxu1 %v848_v0 }
 0x4c0   :  { %725 = vmatpush3.bf16.msra.mxu1 %v906_v3 }
 0x4c1   :  { %726 = vmatprep.subr.bf16.mxu1 %v848_v0 }
 0x4c4   :  { %727 = vmatpush3.bf16.msra.mxu1 %v912_v4 }
 0x4c5   :  { %728 = vmatprep.subr.bf16.mxu1 %v848_v0 }
 0x4c8   :  { %729 = vmatpush3.bf16.msra.mxu1 %v918_v5 }
 0x4c9   :  { %730 = vmatprep.subr.bf16.mxu1 %v848_v0 }
 0x4cc   :  { %731 = vmatpush3.bf16.msra.mxu1 %v924_v6  ;;  %v434_v6 = vunpack.c.h.bf16 %v387_v61 }
 0x4cd   :  { %732 = vmatprep.subr.bf16.mxu1 %v848_v0 }
 0x4d0   :  { %733 = vmatpush3.bf16.msra.mxu1 %v930_v7 }
 0x4d1   :  { %734 = vmatprep.subr.bf16.mxu1 %v848_v0 }
 0x4d4   :  { %735 = vmatpush3.bf16.msra.mxu1 %v936_v8 }
 0x58a   :  { %v378_v54 = vpop.f32.mrb[8].mxu1 }
 0x58b   :  { %v384_v55 = vadd.f32 %v378_v54, %v342_v53  ;;  %v698_v56 = vpop.f32.mrb[9].mxu1 }
 0x58c   :  { %v381_v57 = vpop.f32.mrb[10].mxu1 }
 0x58d   :  { %766 = vtanh.f32 %v384_v55  ;;  %v699_v58 = vpop.f32.mrb[11].mxu1 }
 0x597   :  { %v767_v59 = vpop.eup %766 }
 0x598   :  { %v389_v60 = vpack.c.bf16 %v767_v59, %v767_v59 }
 0x59a   :  { %717 = vmatmul.mubr.bf16.vlgmr.msra.gmra.mrb[12].mxu0 %v389_v60 }
 0x66d   :  { %v424_v63 = vpop.f32.mrb[12].mxu0 }
 0x66e   :  { %v430_v1 = vadd.f32 %v424_v63, %v388_v62  ;;  %v718_v2 = vpop.f32.mrb[13].mxu0 }
 0x66f   :  { %v427_v3 = vpop.f32.mrb[14].mxu0 }
 0x670   :  { %768 = vtanh.f32 %v430_v1  ;;  %v719_v0 = vpop.f32.mrb[15].mxu0 }
 0x67a   :  { %v769_v4 = vpop.eup %768 }
 0x67b   :  { %v435_v5 = vpack.c.bf16 %v769_v4, %v769_v4 }
 0x67d   :  { %737 = vmatmul.mubr.bf16.vlgmr.msra.gmra.mrb[12].mxu1 %v435_v5 }
 0x750   :  { %v470_v7 = vpop.f32.mrb[12].mxu1 }
 0x751   :  { %v476_v8 = vadd.f32 %v470_v7, %v434_v6  ;;  %v738_v9 = vpop.f32.mrb[13].mxu1 }
 0x752   :  { %v473_v10 = vpop.f32.mrb[14].mxu1 }
 0x753   :  { %770 = vtanh.f32 %v476_v8  ;;  %v739_v11 = vpop.f32.mrb[15].mxu1 }
 0x75d   :  { %v771_v12 = vpop.eup %770 }
 0x75e   :  { %483 = vst [vmem:[#allocation8] sm:$0xff] %v771_v12 }
 0x75f   :  { %827 = shalt.err (!%p824_p6)
}
 0x760   :  { %s828_s10 = scalar_lea.hbm %s1065_s2, 128 }
 0x761   :  { %p829_p7 = scmp.ne.s32.totalorder %s1065_s2, %s828_s10  ;;  %p832_p8 = scmp.lt.u32.totalorder %s828_s10, %s1065_s2 }
 0x763   :  { %p834_p9 = pnand %p832_p8, %p829_p7 }
 0x765   :  { %837 = shalt.err (!%p834_p9)
}
 0x766   :  { %493 = dma.vmem_to_hbm [thread:$0]  %s491_s6, 128, %s1065_s2, [#allocation5]  }
 0x767   :  { %842 = dma.done.wait [#allocation5], 128  }
 0x768   :  { %843 = vsyncadd [#allocation5], 4294967168 }
 0x769   :  { %497 = vsyncpa [#allocation4], 1 }
 0x76a   :  { %498 = vsyncpa [#allocation7], 1 }
 0x76b   :  { %499 = vsyncpa [#allocation5], 1 }

</bundles_post_ra>
